<compile_context>
chip_gen: v6e
topology: v6e:2x2x1
jax: 0.10.0
libtpu: 0.0.40
codegen_flags: <defaults>
</compile_context>

<pallas_src>
import functools

import numpy as np
import jax
import jax.numpy as jnp
from jax.experimental import pallas as pl
from jax.experimental.pallas import tpu as pltpu


def _elu(v):
    # torch.nn.ELU(alpha=1.0); clamp before exp so large positives never generate inf.
    return jnp.where(v > 0, v, jnp.exp(jnp.minimum(v, 0.0)) - 1.0)


def _nam_packed_kernel(x_ref, ahot_ref, pvec_ref, w2_ref, w3_ref, w4_ref, wh1_ref,
                       bh2_ref, backbone_ref, sum_ref, *, H, G):
    g = pl.program_id(0)

    xr = x_ref[...]                       # [B, W]   group's feature columns, each repeated H times
    ah = ahot_ref[...]                    # [B, 2]   one-hot treatment
    pv = pvec_ref[0]                      # [8, W]   packed per-group vectors
    w1 = pv[0:1, :]
    b1 = pv[1:2, :]
    b2 = pv[2:3, :]
    b3 = pv[3:4, :]
    b4 = pv[4:5, :]
    bh1 = pv[5:6, :]
    wsel0 = pv[6:7, :]
    wsel1 = pv[7:8, :]

    # layer 1: per-feature Linear(1->H) as a VPU broadcast multiply (no K=1 MXU op).
    h = _elu(xr * w1 + b1)
    # layers 2-4: lane-dense block-diagonal [W, W] matmuls (one MXU push per layer per group).
    h = _elu(jnp.dot(h, w2_ref[0], preferred_element_type=jnp.float32) + b2)
    h = _elu(jnp.dot(h, w3_ref[0], preferred_element_type=jnp.float32) + b3)
    h4 = jnp.dot(h, w4_ref[0], preferred_element_type=jnp.float32) + b4       # [B, W]

    # fold packed features back to [B, H] for the backbone accumulator.
    bsum = h4[:, 0:H]
    for f in range(1, G):
        bsum = bsum + h4[:, f * H:(f + 1) * H]

    # head layer 1 for both treatments of all features at once (block-diagonal [W, W]).
    z = jnp.dot(h4, wh1_ref[0], preferred_element_type=jnp.float32) + bh1     # [B, W]

    # head layer 2 + per-example treatment selection on VPU/XLU: the effective weight keeps
    # only the selected head's wh2 values (other head's lanes are zero), then one lane reduce.
    a0 = ah[:, 0:1]
    a1 = ah[:, 1:2]
    weff = a0 * wsel0 + a1 * wsel1                                            # [B, W]
    sel = jnp.sum(z * weff, axis=-1, keepdims=True)                           # [B, 1]

    @pl.when(g == 0)
    def _():
        backbone_ref[...] = jnp.zeros_like(backbone_ref)
        sum_ref[...] = jnp.zeros_like(sum_ref)

    backbone_ref[...] += bsum
    sum_ref[...] += sel

    @pl.when(g == pl.num_programs(0) - 1)
    def _():
        # treatment-selected final-layer biases, pre-summed over all features in the wrapper.
        sum_ref[...] += jnp.sum(ah * bh2_ref[...], axis=-1, keepdims=True)


def _block_diag(blocks):
    """blocks: [G, R, C] -> [G*R, G*C] block-diagonal (built once in the wrapper)."""
    G, R, C = blocks.shape
    out = jnp.zeros((G * R, G * C), blocks.dtype)
    for f in range(G):
        out = out.at[f * R:(f + 1) * R, f * C:(f + 1) * C].set(blocks[f])
    return out


def _pack_params(params, G):
    """Pack per-feature stacked params into lane-dense per-group operands."""
    F, _, H = params["w1"].shape
    assert H % 2 == 0, "hidden_size must be even (torch uses hidden_size // 2 head width)"
    assert F % G == 0
    M = H // 2
    NG = F // G
    W = G * H            # note: G * 2M == G * H == W

    def grp(a):
        return a.reshape((NG, G) + a.shape[1:])

    w1p = grp(params["w1"])[:, :, 0, :].reshape(NG, W)
    b1p = grp(params["b1"])[:, :, 0, :].reshape(NG, W)
    b2p = grp(params["b2"])[:, :, 0, :].reshape(NG, W)
    b3p = grp(params["b3"])[:, :, 0, :].reshape(NG, W)
    b4p = grp(params["b4"])[:, :, 0, :].reshape(NG, W)

    wh1 = grp(params["wh1"])                        # [NG, G, 2, H, M]
    bh1 = grp(params["bh1"])                        # [NG, G, 2, M]
    wh2 = grp(params["wh2"])                        # [NG, G, 2, M]

    # per feature: [H, 2M] with head-0 columns first, then head-1 columns
    wh1_cat = jnp.transpose(wh1, (0, 1, 3, 2, 4)).reshape(NG, G, H, 2 * M)
    bh1p = bh1.reshape(NG, W)
    zero = jnp.zeros_like(wh2[:, :, 0, :])
    wsel0 = jnp.concatenate([wh2[:, :, 0, :], zero], axis=-1).reshape(NG, W)
    wsel1 = jnp.concatenate([zero, wh2[:, :, 1, :]], axis=-1).reshape(NG, W)

    # one [NG, 8, W] slab: w1, b1..b4, bh1, and the two wh2 selection vectors
    pvec = jnp.stack([w1p, b1p, b2p, b3p, b4p, bh1p, wsel0, wsel1], axis=1)

    w2g = grp(params["w2"])
    w3g = grp(params["w3"])
    w4g = grp(params["w4"])
    W2p = jnp.stack([_block_diag(w2g[g]) for g in range(NG)], axis=0)      # [NG, W, W]
    W3p = jnp.stack([_block_diag(w3g[g]) for g in range(NG)], axis=0)
    W4p = jnp.stack([_block_diag(w4g[g]) for g in range(NG)], axis=0)
    Wh1p = jnp.stack([_block_diag(wh1_cat[g]) for g in range(NG)], axis=0)  # [NG, W, W]

    bh2sum = jnp.sum(params["bh2"], axis=0).reshape(1, 2)                   # [1, 2]
    return pvec, W2p, W3p, W4p, Wh1p, bh2sum


def dragonet_nam_forward(x, a, params, features_per_group=None):
    """Pallas forward pass. x: [B, F] f32, a: [B] int32 in {0, 1}."""
    B, F = x.shape
    H = params["w2"].shape[-1]
    G = F if features_per_group is None else features_per_group   # F=4, H=32 -> one 128-lane group
    NG = F // G
    W = G * H

    pvec, W2p, W3p, W4p, Wh1p, bh2sum = _pack_params(params, G)

    # lane-packed input: column (i*H + j) holds x[:, i] (feature i repeated H times).
    x_rep = jnp.repeat(x, H, axis=1)                               # [B, F*H]
    ahot = jax.nn.one_hot(a, 2, dtype=jnp.float32)                 # [B, 2]

    kernel = functools.partial(_nam_packed_kernel, H=H, G=G)

    grid_spec = pltpu.PrefetchScalarGridSpec(
        num_scalar_prefetch=0,
        grid=(NG,),
        in_specs=[
            pl.BlockSpec((B, W), lambda g: (0, g)),          # x_rep (this group's lanes)
            pl.BlockSpec((B, 2), lambda g: (0, 0)),          # ahot
            pl.BlockSpec((1, 8, W), lambda g: (g, 0, 0)),    # packed vectors slab
            pl.BlockSpec((1, W, W), lambda g: (g, 0, 0)),    # W2 block-diag
            pl.BlockSpec((1, W, W), lambda g: (g, 0, 0)),    # W3 block-diag
            pl.BlockSpec((1, W, W), lambda g: (g, 0, 0)),    # W4 block-diag
            pl.BlockSpec((1, W, W), lambda g: (g, 0, 0)),    # Wh1 block-diag (both heads)
            pl.BlockSpec((1, 2), lambda g: (0, 0)),          # bh2 summed over all features
        ],
        out_specs=[
            pl.BlockSpec((B, H), lambda g: (0, 0)),          # backbone_sum accumulator
            pl.BlockSpec((B, 1), lambda g: (0, 0)),          # sum_out accumulator
        ],
    )

    out_shapes = (
        jax.ShapeDtypeStruct((B, H), jnp.float32),
        jax.ShapeDtypeStruct((B, 1), jnp.float32),
    )

    return pl.pallas_call(
        kernel,
        out_shape=out_shapes,
        grid_spec=grid_spec,
        compiler_params=pltpu.CompilerParams(
            dimension_semantics=("arbitrary",),   # outputs accumulate across feature groups
        ),
    )(x_rep, ahot, pvec, W2p, W3p, W4p, Wh1p, bh2sum)


def reference_forward(x, a, params):
    """Pure-JAX reference (same math as the torch forward with test=False)."""
    B, F = x.shape
    H = params["w2"].shape[-1]
    ahot = jax.nn.one_hot(a, 2, dtype=jnp.float32)
    backbone_sum = jnp.zeros((B, H), jnp.float32)
    sum_out = jnp.zeros((B, 1), jnp.float32)
    for i in range(F):
        xi = x[:, i:i + 1]
        h = _elu(xi * params["w1"][i] + params["b1"][i])     # Linear(1->H) == broadcast
        h = _elu(h @ params["w2"][i] + params["b2"][i])
        h = _elu(h @ params["w3"][i] + params["b3"][i])
        h4 = h @ params["w4"][i] + params["b4"][i]
        ys = []
        for k in range(2):
            z = h4 @ params["wh1"][i, k] + params["bh1"][i, k]                    # [B, M]
            y = jnp.sum(z * params["wh2"][i, k][None, :], axis=1, keepdims=True) \
                + params["bh2"][i, k]                                             # [B, 1]
            ys.append(y)
        y_all = jnp.concatenate(ys, axis=1)                                       # [B, 2]
        sel = jnp.sum(y_all * ahot, axis=1, keepdims=True)
        backbone_sum = backbone_sum + h4
        sum_out = sum_out + sel
    return backbone_sum, sum_out


def make_params(key, F, H):
    """Deterministic synthetic init (PyTorch-Linear-style uniform bounds), stacked over features."""
    M = H // 2
    ks = jax.random.split(key, 12)

    def u(k, fan_in, shape):
        b = 1.0 / np.sqrt(fan_in)
        return jax.random.uniform(k, shape, jnp.float32, -b, b)

    return {
        # backbone (per feature): Linear(1,H) ELU Linear(H,H) ELU Linear(H,H) ELU Linear(H,H)
        "w1": u(ks[0], 1, (F, 1, H)), "b1": u(ks[1], 1, (F, 1, H)),
        "w2": u(ks[2], H, (F, H, H)), "b2": u(ks[3], H, (F, 1, H)),
        "w3": u(ks[4], H, (F, H, H)), "b3": u(ks[5], H, (F, 1, H)),
        "w4": u(ks[6], H, (F, H, H)), "b4": u(ks[7], H, (F, 1, H)),
        # two treatment heads per feature: Linear(H->M) then Linear(M->1)
        "wh1": u(ks[8], H, (F, 2, H, M)), "bh1": u(ks[9], H, (F, 2, M)),
        "wh2": u(ks[10], M, (F, 2, M)),   "bh2": u(ks[11], M, (F, 2)),
    }


if __name__ == "__main__":
    B, F, H = 8, 4, 32     # batch, input_size (num features), hidden_size

    key = jax.random.PRNGKey(0)
    kx, ka, kp = jax.random.split(key, 3)
    x = jax.random.normal(kx, (B, F), jnp.float32)
    a = jax.random.randint(ka, (B,), 0, 2, jnp.int32)     # treatment in {0, 1}
    params = make_params(kp, F, H)

    backbone_sum, sum_out = dragonet_nam_forward(x, a, params)
    backbone_sum = jax.block_until_ready(backbone_sum)
    sum_out = jax.block_until_ready(sum_out)

    ref_backbone, ref_sum = reference_forward(x, a, params)
    assert backbone_sum.shape == (B, H) and sum_out.shape == (B, 1)
    np.testing.assert_allclose(np.asarray(backbone_sum), np.asarray(ref_backbone),
                               rtol=2e-5, atol=2e-5)
    np.testing.assert_allclose(np.asarray(sum_out), np.asarray(ref_sum),
                               rtol=2e-5, atol=2e-5)
    print("KERNEL_OK")
</pallas_src>

<mosaic_0001>
module attributes {stable_mosaic.version = 11 : i64} {
  func.func @_nam_packed_kernel(%arg0: i32, %arg1: memref<8x128xf32, #tpu.memory_space<vmem>>, %arg2: memref<8x2xf32, #tpu.memory_space<vmem>>, %arg3: memref<1x8x128xf32, #tpu.memory_space<vmem>>, %arg4: memref<1x128x128xf32, #tpu.memory_space<vmem>>, %arg5: memref<1x128x128xf32, #tpu.memory_space<vmem>>, %arg6: memref<1x128x128xf32, #tpu.memory_space<vmem>>, %arg7: memref<1x128x128xf32, #tpu.memory_space<vmem>>, %arg8: memref<1x2xf32, #tpu.memory_space<vmem>>, %arg9: memref<8x32xf32, #tpu.memory_space<vmem>>, %arg10: memref<8x1xf32, #tpu.memory_space<vmem>>) attributes {dimension_semantics = [#tpu.dimension_semantics<arbitrary>], iteration_bounds = array<i64: 1>, scalar_prefetch = 0 : i64, scratch_operands = 0 : i64, tpu.core_type = #tpu.core_type<tc>, window_params = [{transform_indices = @transform_0, window_bounds = array<i64: 8, 128>}, {pipeline_mode = #tpu.pipeline_mode<synchronous>, transform_indices = @transform_1, window_bounds = array<i64: 8, 2>}, {transform_indices = @transform_2, window_bounds = array<i64: 1, 8, 128>}, {transform_indices = @transform_3, window_bounds = array<i64: 1, 128, 128>}, {transform_indices = @transform_4, window_bounds = array<i64: 1, 128, 128>}, {transform_indices = @transform_5, window_bounds = array<i64: 1, 128, 128>}, {transform_indices = @transform_6, window_bounds = array<i64: 1, 128, 128>}, {pipeline_mode = #tpu.pipeline_mode<synchronous>, transform_indices = @transform_7, window_bounds = array<i64: 1, 2>}, {pipeline_mode = #tpu.pipeline_mode<synchronous>, transform_indices = @transform_8, window_bounds = array<i64: 8, 32>}, {pipeline_mode = #tpu.pipeline_mode<synchronous>, transform_indices = @transform_9, window_bounds = array<i64: 8, 1>}]} {
    %c0 = arith.constant 0 : index
    %c0_0 = arith.constant 0 : index
    %0 = vector.load %arg1[%c0, %c0_0] : memref<8x128xf32, #tpu.memory_space<vmem>>, vector<8x128xf32>
    %c0_1 = arith.constant 0 : index
    %c0_2 = arith.constant 0 : index
    %1 = vector.load %arg2[%c0_1, %c0_2] : memref<8x2xf32, #tpu.memory_space<vmem>>, vector<8x2xf32>
    %c0_3 = arith.constant 0 : index
    %c0_4 = arith.constant 0 : index
    %c0_5 = arith.constant 0 : index
    %2 = vector.load %arg3[%c0_3, %c0_4, %c0_5] : memref<1x8x128xf32, #tpu.memory_space<vmem>>, vector<1x8x128xf32>
    %3 = vector.shape_cast %2 : vector<1x8x128xf32> to vector<8x128xf32>
    %4 = vector.extract_strided_slice %3 {offsets = [0, 0], sizes = [1, 128], strides = [1, 1]} : vector<8x128xf32> to vector<1x128xf32>
    %5 = vector.extract_strided_slice %3 {offsets = [1, 0], sizes = [1, 128], strides = [1, 1]} : vector<8x128xf32> to vector<1x128xf32>
    %6 = vector.extract_strided_slice %3 {offsets = [2, 0], sizes = [1, 128], strides = [1, 1]} : vector<8x128xf32> to vector<1x128xf32>
    %7 = vector.extract_strided_slice %3 {offsets = [3, 0], sizes = [1, 128], strides = [1, 1]} : vector<8x128xf32> to vector<1x128xf32>
    %8 = vector.extract_strided_slice %3 {offsets = [4, 0], sizes = [1, 128], strides = [1, 1]} : vector<8x128xf32> to vector<1x128xf32>
    %9 = vector.extract_strided_slice %3 {offsets = [5, 0], sizes = [1, 128], strides = [1, 1]} : vector<8x128xf32> to vector<1x128xf32>
    %10 = vector.extract_strided_slice %3 {offsets = [6, 0], sizes = [1, 128], strides = [1, 1]} : vector<8x128xf32> to vector<1x128xf32>
    %11 = vector.extract_strided_slice %3 {offsets = [7, 0], sizes = [1, 128], strides = [1, 1]} : vector<8x128xf32> to vector<1x128xf32>
    %12 = vector.broadcast %4 : vector<1x128xf32> to vector<8x128xf32>
    %13 = arith.mulf %0, %12 : vector<8x128xf32>
    %14 = vector.broadcast %5 : vector<1x128xf32> to vector<8x128xf32>
    %15 = arith.addf %13, %14 : vector<8x128xf32>
    %cst = arith.constant 0.000000e+00 : f32
    %16 = vector.broadcast %cst : f32 to vector<8x128xf32>
    %17 = arith.cmpf ogt, %15, %16 : vector<8x128xf32>
    %cst_6 = arith.constant 0.000000e+00 : f32
    %18 = vector.broadcast %cst_6 : f32 to vector<8x128xf32>
    %19 = arith.minimumf %15, %18 : vector<8x128xf32>
    %20 = math.exp %19 : vector<8x128xf32>
    %cst_7 = arith.constant 1.000000e+00 : f32
    %21 = vector.broadcast %cst_7 : f32 to vector<8x128xf32>
    %22 = arith.subf %20, %21 : vector<8x128xf32>
    %23 = arith.select %17, %15, %22 : vector<8x128xi1>, vector<8x128xf32>
    %c0_8 = arith.constant 0 : index
    %c0_9 = arith.constant 0 : index
    %c0_10 = arith.constant 0 : index
    %24 = vector.load %arg4[%c0_8, %c0_9, %c0_10] : memref<1x128x128xf32, #tpu.memory_space<vmem>>, vector<1x128x128xf32>
    %25 = vector.shape_cast %24 : vector<1x128x128xf32> to vector<128x128xf32>
    %cst_11 = arith.constant dense<0.000000e+00> : vector<8x128xf32>
    %26 = tpu.matmul %23, %25, %cst_11 {dimension_numbers = #tpu.dot_dimension_numbers<[1], [0], [0], [1], [0, 0, 1, 1], [], []>} : vector<8x128xf32>, vector<128x128xf32>, vector<8x128xf32> -> vector<8x128xf32>
    %27 = vector.broadcast %6 : vector<1x128xf32> to vector<8x128xf32>
    %28 = arith.addf %26, %27 : vector<8x128xf32>
    %cst_12 = arith.constant 0.000000e+00 : f32
    %29 = vector.broadcast %cst_12 : f32 to vector<8x128xf32>
    %30 = arith.cmpf ogt, %28, %29 : vector<8x128xf32>
    %cst_13 = arith.constant 0.000000e+00 : f32
    %31 = vector.broadcast %cst_13 : f32 to vector<8x128xf32>
    %32 = arith.minimumf %28, %31 : vector<8x128xf32>
    %33 = math.exp %32 : vector<8x128xf32>
    %cst_14 = arith.constant 1.000000e+00 : f32
    %34 = vector.broadcast %cst_14 : f32 to vector<8x128xf32>
    %35 = arith.subf %33, %34 : vector<8x128xf32>
    %36 = arith.select %30, %28, %35 : vector<8x128xi1>, vector<8x128xf32>
    %c0_15 = arith.constant 0 : index
    %c0_16 = arith.constant 0 : index
    %c0_17 = arith.constant 0 : index
    %37 = vector.load %arg5[%c0_15, %c0_16, %c0_17] : memref<1x128x128xf32, #tpu.memory_space<vmem>>, vector<1x128x128xf32>
    %38 = vector.shape_cast %37 : vector<1x128x128xf32> to vector<128x128xf32>
    %cst_18 = arith.constant dense<0.000000e+00> : vector<8x128xf32>
    %39 = tpu.matmul %36, %38, %cst_18 {dimension_numbers = #tpu.dot_dimension_numbers<[1], [0], [0], [1], [0, 0, 1, 1], [], []>} : vector<8x128xf32>, vector<128x128xf32>, vector<8x128xf32> -> vector<8x128xf32>
    %40 = vector.broadcast %7 : vector<1x128xf32> to vector<8x128xf32>
    %41 = arith.addf %39, %40 : vector<8x128xf32>
    %cst_19 = arith.constant 0.000000e+00 : f32
    %42 = vector.broadcast %cst_19 : f32 to vector<8x128xf32>
    %43 = arith.cmpf ogt, %41, %42 : vector<8x128xf32>
    %cst_20 = arith.constant 0.000000e+00 : f32
    %44 = vector.broadcast %cst_20 : f32 to vector<8x128xf32>
    %45 = arith.minimumf %41, %44 : vector<8x128xf32>
    %46 = math.exp %45 : vector<8x128xf32>
    %cst_21 = arith.constant 1.000000e+00 : f32
    %47 = vector.broadcast %cst_21 : f32 to vector<8x128xf32>
    %48 = arith.subf %46, %47 : vector<8x128xf32>
    %49 = arith.select %43, %41, %48 : vector<8x128xi1>, vector<8x128xf32>
    %c0_22 = arith.constant 0 : index
    %c0_23 = arith.constant 0 : index
    %c0_24 = arith.constant 0 : index
    %50 = vector.load %arg6[%c0_22, %c0_23, %c0_24] : memref<1x128x128xf32, #tpu.memory_space<vmem>>, vector<1x128x128xf32>
    %51 = vector.shape_cast %50 : vector<1x128x128xf32> to vector<128x128xf32>
    %cst_25 = arith.constant dense<0.000000e+00> : vector<8x128xf32>
    %52 = tpu.matmul %49, %51, %cst_25 {dimension_numbers = #tpu.dot_dimension_numbers<[1], [0], [0], [1], [0, 0, 1, 1], [], []>} : vector<8x128xf32>, vector<128x128xf32>, vector<8x128xf32> -> vector<8x128xf32>
    %53 = vector.broadcast %8 : vector<1x128xf32> to vector<8x128xf32>
    %54 = arith.addf %52, %53 : vector<8x128xf32>
    %55 = vector.extract_strided_slice %54 {offsets = [0, 0], sizes = [8, 32], strides = [1, 1]} : vector<8x128xf32> to vector<8x32xf32>
    %56 = vector.extract_strided_slice %54 {offsets = [0, 32], sizes = [8, 32], strides = [1, 1]} : vector<8x128xf32> to vector<8x32xf32>
    %57 = arith.addf %55, %56 : vector<8x32xf32>
    %58 = vector.extract_strided_slice %54 {offsets = [0, 64], sizes = [8, 32], strides = [1, 1]} : vector<8x128xf32> to vector<8x32xf32>
    %59 = arith.addf %57, %58 : vector<8x32xf32>
    %60 = vector.extract_strided_slice %54 {offsets = [0, 96], sizes = [8, 32], strides = [1, 1]} : vector<8x128xf32> to vector<8x32xf32>
    %61 = arith.addf %59, %60 : vector<8x32xf32>
    %c0_26 = arith.constant 0 : index
    %c0_27 = arith.constant 0 : index
    %c0_28 = arith.constant 0 : index
    %62 = vector.load %arg7[%c0_26, %c0_27, %c0_28] : memref<1x128x128xf32, #tpu.memory_space<vmem>>, vector<1x128x128xf32>
    %63 = vector.shape_cast %62 : vector<1x128x128xf32> to vector<128x128xf32>
    %cst_29 = arith.constant dense<0.000000e+00> : vector<8x128xf32>
    %64 = tpu.matmul %54, %63, %cst_29 {dimension_numbers = #tpu.dot_dimension_numbers<[1], [0], [0], [1], [0, 0, 1, 1], [], []>} : vector<8x128xf32>, vector<128x128xf32>, vector<8x128xf32> -> vector<8x128xf32>
    %65 = vector.broadcast %9 : vector<1x128xf32> to vector<8x128xf32>
    %66 = arith.addf %64, %65 : vector<8x128xf32>
    %67 = vector.extract_strided_slice %1 {offsets = [0, 0], sizes = [8, 1], strides = [1, 1]} : vector<8x2xf32> to vector<8x1xf32>
    %68 = vector.extract_strided_slice %1 {offsets = [0, 1], sizes = [8, 1], strides = [1, 1]} : vector<8x2xf32> to vector<8x1xf32>
    %69 = vector.broadcast %67 : vector<8x1xf32> to vector<8x128xf32>
    %70 = vector.broadcast %10 : vector<1x128xf32> to vector<8x128xf32>
    %71 = arith.mulf %69, %70 : vector<8x128xf32>
    %72 = vector.broadcast %68 : vector<8x1xf32> to vector<8x128xf32>
    %73 = vector.broadcast %11 : vector<1x128xf32> to vector<8x128xf32>
    %74 = arith.mulf %72, %73 : vector<8x128xf32>
    %75 = arith.addf %71, %74 : vector<8x128xf32>
    %76 = arith.mulf %66, %75 : vector<8x128xf32>
    %cst_30 = arith.constant dense<0.000000e+00> : vector<8xf32>
    %77 = vector.multi_reduction <add>, %76, %cst_30 [1] : vector<8x128xf32> to vector<8xf32>
    %78 = vector.shape_cast %77 : vector<8xf32> to vector<8x1xf32>
    %c0_i32 = arith.constant 0 : i32
    %79 = arith.cmpi eq, %arg0, %c0_i32 : i32
    %80 = arith.extui %79 : i1 to i32
    %c0_i32_31 = arith.constant 0 : i32
    %81 = arith.cmpi ne, %80, %c0_i32_31 : i32
    scf.if %81 {
      %cst_42 = arith.constant 0.000000e+00 : f32
      %91 = vector.broadcast %cst_42 : f32 to vector<8x32xf32>
      %c0_43 = arith.constant 0 : index
      %c0_44 = arith.constant 0 : index
      %92 = vector.load %arg9[%c0_43, %c0_44] : memref<8x32xf32, #tpu.memory_space<vmem>>, vector<8x32xf32>
      tpu.vector_store %arg9[%c0_43, %c0_44], %91 {strides = array<i32>} : memref<8x32xf32, #tpu.memory_space<vmem>>, vector<8x32xf32>,
      %cst_45 = arith.constant 0.000000e+00 : f32
      %93 = vector.broadcast %cst_45 : f32 to vector<8x1xf32>
      %c0_46 = arith.constant 0 : index
      %c0_47 = arith.constant 0 : index
      %94 = vector.load %arg10[%c0_46, %c0_47] : memref<8x1xf32, #tpu.memory_space<vmem>>, vector<8x1xf32>
      tpu.vector_store %arg10[%c0_46, %c0_47], %93 {strides = array<i32>} : memref<8x1xf32, #tpu.memory_space<vmem>>, vector<8x1xf32>,
    } else {
    }
    %c0_32 = arith.constant 0 : index
    %c0_33 = arith.constant 0 : index
    %82 = vector.load %arg9[%c0_32, %c0_33] : memref<8x32xf32, #tpu.memory_space<vmem>>, vector<8x32xf32>
    %83 = arith.addf %82, %61 : vector<8x32xf32>
    %c0_34 = arith.constant 0 : index
    %c0_35 = arith.constant 0 : index
    %84 = vector.load %arg9[%c0_34, %c0_35] : memref<8x32xf32, #tpu.memory_space<vmem>>, vector<8x32xf32>
    tpu.vector_store %arg9[%c0_34, %c0_35], %83 {strides = array<i32>} : memref<8x32xf32, #tpu.memory_space<vmem>>, vector<8x32xf32>,
    %c0_36 = arith.constant 0 : index
    %c0_37 = arith.constant 0 : index
    %85 = vector.load %arg10[%c0_36, %c0_37] : memref<8x1xf32, #tpu.memory_space<vmem>>, vector<8x1xf32>
    %86 = arith.addf %85, %78 : vector<8x1xf32>
    %c0_38 = arith.constant 0 : index
    %c0_39 = arith.constant 0 : index
    %87 = vector.load %arg10[%c0_38, %c0_39] : memref<8x1xf32, #tpu.memory_space<vmem>>, vector<8x1xf32>
    tpu.vector_store %arg10[%c0_38, %c0_39], %86 {strides = array<i32>} : memref<8x1xf32, #tpu.memory_space<vmem>>, vector<8x1xf32>,
    %c0_i32_40 = arith.constant 0 : i32
    %88 = arith.cmpi eq, %arg0, %c0_i32_40 : i32
    %89 = arith.extui %88 : i1 to i32
    %c0_i32_41 = arith.constant 0 : i32
    %90 = arith.cmpi ne, %89, %c0_i32_41 : i32
    scf.if %90 {
      %c0_42 = arith.constant 0 : index
      %c0_43 = arith.constant 0 : index
      %91 = vector.load %arg10[%c0_42, %c0_43] : memref<8x1xf32, #tpu.memory_space<vmem>>, vector<8x1xf32>
      %c0_44 = arith.constant 0 : index
      %c0_45 = arith.constant 0 : index
      %92 = vector.load %arg8[%c0_44, %c0_45] : memref<1x2xf32, #tpu.memory_space<vmem>>, vector<1x2xf32>
      %93 = vector.broadcast %92 : vector<1x2xf32> to vector<8x2xf32>
      %94 = arith.mulf %1, %93 : vector<8x2xf32>
      %cst_46 = arith.constant dense<0.000000e+00> : vector<8xf32>
      %95 = vector.multi_reduction <add>, %94, %cst_46 [1] : vector<8x2xf32> to vector<8xf32>
      %96 = vector.shape_cast %95 : vector<8xf32> to vector<8x1xf32>
      %97 = arith.addf %91, %96 : vector<8x1xf32>
      %c0_47 = arith.constant 0 : index
      %c0_48 = arith.constant 0 : index
      %98 = vector.load %arg10[%c0_47, %c0_48] : memref<8x1xf32, #tpu.memory_space<vmem>>, vector<8x1xf32>
      tpu.vector_store %arg10[%c0_47, %c0_48], %97 {strides = array<i32>} : memref<8x1xf32, #tpu.memory_space<vmem>>, vector<8x1xf32>,
    } else {
    }
    return
  }
  func.func @transform_0(%arg0: i32) -> (i32, i32) {
    %c0_i32 = arith.constant 0 : i32
    %c0_i32_0 = arith.constant 0 : i32
    return %c0_i32, %arg0 : i32, i32
  }
  func.func @transform_1(%arg0: i32) -> (i32, i32) {
    %c0_i32 = arith.constant 0 : i32
    %c0_i32_0 = arith.constant 0 : i32
    %c0_i32_1 = arith.constant 0 : i32
    return %c0_i32, %c0_i32_0 : i32, i32
  }
  func.func @transform_2(%arg0: i32) -> (i32, i32, i32) {
    %c0_i32 = arith.constant 0 : i32
    %c0_i32_0 = arith.constant 0 : i32
    %c0_i32_1 = arith.constant 0 : i32
    return %arg0, %c0_i32, %c0_i32_0 : i32, i32, i32
  }
  func.func @transform_3(%arg0: i32) -> (i32, i32, i32) {
    %c0_i32 = arith.constant 0 : i32
    %c0_i32_0 = arith.constant 0 : i32
    %c0_i32_1 = arith.constant 0 : i32
    return %arg0, %c0_i32, %c0_i32_0 : i32, i32, i32
  }
  func.func @transform_4(%arg0: i32) -> (i32, i32, i32) {
    %c0_i32 = arith.constant 0 : i32
    %c0_i32_0 = arith.constant 0 : i32
    %c0_i32_1 = arith.constant 0 : i32
    return %arg0, %c0_i32, %c0_i32_0 : i32, i32, i32
  }
  func.func @transform_5(%arg0: i32) -> (i32, i32, i32) {
    %c0_i32 = arith.constant 0 : i32
    %c0_i32_0 = arith.constant 0 : i32
    %c0_i32_1 = arith.constant 0 : i32
    return %arg0, %c0_i32, %c0_i32_0 : i32, i32, i32
  }
  func.func @transform_6(%arg0: i32) -> (i32, i32, i32) {
    %c0_i32 = arith.constant 0 : i32
    %c0_i32_0 = arith.constant 0 : i32
    %c0_i32_1 = arith.constant 0 : i32
    return %arg0, %c0_i32, %c0_i32_0 : i32, i32, i32
  }
  func.func @transform_7(%arg0: i32) -> (i32, i32) {
    %c0_i32 = arith.constant 0 : i32
    %c0_i32_0 = arith.constant 0 : i32
    %c0_i32_1 = arith.constant 0 : i32
    return %c0_i32, %c0_i32_0 : i32, i32
  }
  func.func @transform_8(%arg0: i32) -> (i32, i32) {
    %c0_i32 = arith.constant 0 : i32
    %c0_i32_0 = arith.constant 0 : i32
    %c0_i32_1 = arith.constant 0 : i32
    return %c0_i32, %c0_i32_0 : i32, i32
  }
  func.func @transform_9(%arg0: i32) -> (i32, i32) {
    %c0_i32 = arith.constant 0 : i32
    %c0_i32_0 = arith.constant 0 : i32
    %c0_i32_1 = arith.constant 0 : i32
    return %c0_i32, %c0_i32_0 : i32, i32
  }
}

</mosaic_0001>

<bundles_post_ra>
// kernel: tpu_custom_call.1
= control target key start
LH: loop header
LB: loop body
LE: loop exit
PB: predicated region body
PF: predicated region fallthrough
CT: control target
= control target key end

     0   :  { %15 = vsyncpa [#allocation3], 0  ;;  %s1166_s0 = inlined_call_operand.vmem [shape: f32[8,128], index: 0, kind: input, shape index: {}]   ;;  %s1167_s1 = inlined_call_operand.vmem [shape: f32[8,2], index: 1, kind: input, shape index: {}]   ;;  %s1168_s2 = inlined_call_operand.hbm [shape: f32[1,8,128], index: 2, kind: input, shape index: {}]   ;;  %s1169_s3 = inlined_call_operand.hbm [shape: f32[1,128,128], index: 3, kind: input, shape index: {}]   ;;  %s1170_s4 = inlined_call_operand.hbm [shape: f32[1,128,128], index: 4, kind: input, shape index: {}]   ;;  %s1171_s5 = inlined_call_operand.hbm [shape: f32[1,128,128], index: 5, kind: input, shape index: {}]   ;;  %s1172_s6 = inlined_call_operand.hbm [shape: f32[1,128,128], index: 6, kind: input, shape index: {}]   ;;  %s1173_s7 = inlined_call_operand.vmem [shape: f32[1,2], index: 7, kind: input, shape index: {}]   ;;  %s1174_s8 = inlined_call_operand.hbm [shape: f32[8,32], index: 8, kind: output, shape index: {0}]   ;;  %s1175_s9 = inlined_call_operand.vmem [shape: f32[8,1], index: 9, kind: output, shape index: {1}]  }
   0x1   :  { %16 = vsyncpa [#allocation6], 0 }
   0x2   :  { %17 = vsyncpa [#allocation9], 0 }
   0x3   :  { %18 = vsyncpa [#allocation4], 0  ;;  %s943_s30 = smov [#allocation5]  }
   0x4   :  { %s38_s10 = sshll.u32 %s943_s30, 4  ;;  %s39_s10 = int_to_ptr.vmem [resolvable:$true] %s38_s10 }
   0x5   :  { %s823_s11 = scalar_lea.vmem %s39_s10, 2048  ;;  %p828_p1 = scmp.lt.s32.totalorder %s39_s10, %s39_s10 }
   0x6   :  { %p824_p0 = scmp.ne.s32.totalorder %s39_s10, %s823_s11  ;;  %p829_p2 = scmp.lt.s32.totalorder %s823_s11, %s823_s11 }
   0x8   :  { %p830_p3 = por %p829_p2, %p828_p1 }
   0xa   :  { %p831_p4 = pnand %p830_p3, %p824_p0 }
   0xc   :  { %834 = shalt.err (!%p831_p4)
}
   0xd   :  { %s944_s12 = smov 128   ;;  %s945_s13 = smov 8  }
   0xe   :  { %44 = dma.hbm_to_vmem [thread:$0]  %s1169_s3, 2048, %s39_s10, [#allocation6], %s944_s12, %s944_s12, %s945_s13  }
   0xf   :  { %s946_s16 = smov [#allocation8]   ;;  %s947_s18 = smov [#allocation2]  }
  0x10   :  { %s62_s17 = sshll.u32 %s946_s16, 4  ;;  %s29_s19 = sshll.u32 %s947_s18, 4  ;;  %s63_s17 = int_to_ptr.vmem [resolvable:$true] %s62_s17  ;;  %s30_s19 = int_to_ptr.vmem [resolvable:$true] %s29_s19 }
  0x11   :  { %s843_s20 = scalar_lea.vmem %s63_s17, 2048  ;;  %p848_p6 = scmp.lt.s32.totalorder %s63_s17, %s63_s17 }
  0x12   :  { %p844_p5 = scmp.ne.s32.totalorder %s63_s17, %s843_s20  ;;  %p849_p7 = scmp.lt.s32.totalorder %s843_s20, %s843_s20 }
  0x14   :  { %p850_p8 = por %p849_p7, %p848_p6 }
  0x16   :  { %p851_p9 = pnand %p850_p8, %p844_p5 }
  0x18   :  { %854 = shalt.err (!%p851_p9)
}
  0x19   :  { %68 = dma.hbm_to_vmem [thread:$0]  %s1171_s5, 2048, %s63_s17, [#allocation9], %s944_s12, %s944_s12, %s945_s13  }
  0x1a   :  { %s863_s3 = scalar_lea.vmem %s30_s19, 128  ;;  %p868_p11 = scmp.lt.s32.totalorder %s30_s19, %s30_s19 }
  0x1b   :  { %p864_p10 = scmp.ne.s32.totalorder %s30_s19, %s863_s3  ;;  %p869_p12 = scmp.lt.s32.totalorder %s863_s3, %s863_s3 }
  0x1d   :  { %p870_p13 = por %p869_p12, %p868_p11 }
  0x1f   :  { %p871_p0 = pnand %p870_p13, %p864_p10 }
  0x21   :  { %874 = shalt.err (!%p871_p0)
}
  0x22   :  { %32 = dma.hbm_to_vmem [thread:$0]  %s1168_s2, 128, %s30_s19, [#allocation3]  }
  0x23   :  { %s948_s25 = smov [#allocation7]   ;;  %s949_s27 = smov [#allocation10]  }
  0x24   :  { %s50_s26 = sshll.u32 %s948_s25, 4  ;;  %s74_s28 = sshll.u32 %s949_s27, 4  ;;  %s51_s26 = int_to_ptr.vmem [resolvable:$true] %s50_s26  ;;  %s75_s28 = int_to_ptr.vmem [resolvable:$true] %s74_s28 }
  0x25   :  { %s883_s29 = scalar_lea.vmem %s51_s26, 2048  ;;  %p888_p2 = scmp.lt.s32.totalorder %s51_s26, %s51_s26 }
  0x26   :  { %p884_p1 = scmp.ne.s32.totalorder %s51_s26, %s883_s29  ;;  %p889_p3 = scmp.lt.s32.totalorder %s883_s29, %s883_s29 }
  0x28   :  { %p890_p4 = por %p889_p3, %p888_p2 }
  0x2a   :  { %p891_p5 = pnand %p890_p4, %p884_p1 }
  0x2c   :  { %894 = shalt.err (!%p891_p5)
}
  0x2d   :  { %56 = dma.hbm_to_vmem [thread:$0]  %s1170_s4, 2048, %s51_s26, [#allocation6], %s944_s12, %s944_s12, %s945_s13  }
  0x2e   :  { %s903_s2 = scalar_lea.vmem %s75_s28, 2048  ;;  %p908_p7 = scmp.lt.s32.totalorder %s75_s28, %s75_s28 }
  0x2f   :  { %p904_p6 = scmp.ne.s32.totalorder %s75_s28, %s903_s2  ;;  %p909_p8 = scmp.lt.s32.totalorder %s903_s2, %s903_s2 }
  0x31   :  { %p910_p9 = por %p909_p8, %p908_p7 }
  0x33   :  { %p911_p10 = pnand %p910_p9, %p904_p6 }
  0x35   :  { %914 = shalt.err (!%p911_p10)
}
  0x36   :  { %80 = dma.hbm_to_vmem [thread:$0]  %s1172_s6, 2048, %s75_s28, [#allocation9], %s944_s12, %s944_s12, %s945_s13  }
  0x37   :  { %935 = dma.done.wait [#allocation3], 128  }
  0x38   :  { %936 = vsyncadd [#allocation3], 4294967168 }
  0x39   :  { %937 = dma.done.wait [#allocation6], 4096  }
  0x3a   :  { %938 = vsyncadd [#allocation6], 4294963200 }
  0x3b   :  { %939 = dma.done.wait [#allocation9], 4096  }
  0x3c   :  { %940 = vsyncadd [#allocation9], 4294963200  ;;  %v950_v0 = vmov 0.0   ;;  %vm951_vm0 = vmmov 0   ;;  %v101_v1 = vlaneseq  ;;  %v132_v3 = vld [vmem:[#allocation5 + $0x78] sm:$0xff]  ;;  %v131_v4 = vld [vmem:[#allocation5 + $0x70] sm:$0xff] }
  0x3d   :  { %652 = vmatprep.subr.mxu0 %v950_v0  ;;  %684 = vmatprep.mubr.msk.f32.mxu0 %vm951_vm0, %v950_v0  ;;  %v130_v5 = vld [vmem:[#allocation5 + $0x68] sm:$0xff]  ;;  %v129_v8 = vld [vmem:[#allocation5 + $0x60] sm:$0xff]  ;;  %v98_v9 = vld [vmem:[%s1166_s0] sm:$0xff]  ;;  %s955_s13 = smov 32   ;;  %vm553_vm4 = vcmask 15360   ;;  %vm531_vm5 = vcmask 7168  }
  0x3e   :  { %687 = vmatprep.subr.mxu1 %v950_v0  ;;  %719 = vmatprep.mubr.msk.f32.mxu1 %vm951_vm0, %v950_v0  ;;  %v1041_v2 = vshrl.u32 %v101_v1, 7  ;;  %v1050_v10 = vld [vmem:[#allocation2] sm:$0xff]  ;;  %v227_v15 = vld [vmem:[#allocation7 + $0x70] sm:$0xff]  ;;  %v226_v18 = vld [vmem:[#allocation7 + $0x68] sm:$0xff]  ;;  %532 = vst.msk [vmem:[%s1175_s9] sm:$0xff] %vm531_vm5, %v950_v0  ;;  %vm529_vm6 = vcmask 261120  }
  0x3f   :  { %653 = vmatpush3.msra.mxu0 %v132_v3  ;;  %v128_v11 = vld [vmem:[#allocation5 + $0x58] sm:$0xff]  ;;  %v127_v16 = vld [vmem:[#allocation5 + $0x50] sm:$0xff]  ;;  %v126_v19 = vld [vmem:[#allocation5 + $0x48] sm:$0xff]  ;;  %530 = vst.msk [vmem:[#allocation11] sm:$0xff] %vm529_vm6, %v950_v0  ;;  %s957_s22 = smov [#allocation11]  }
  0x40   :  { %654 = vmatprep.subr.mxu0 %v950_v0  ;;  %v103_v6 = vsub.s32 0, %v1041_v2  ;;  %v108_v7 = vsub.s32 1, %v1041_v2  ;;  %v228_v14 = vld [vmem:[#allocation7 + $0x78] sm:$0xff]  ;;  %v225_v21 = vld [vmem:[#allocation7 + $0x60] sm:$0xff]  ;;  %v123_v26 = vld [vmem:[#allocation5 + $0x30] sm:$0xff]  ;;  %v135_v52 = vsub.s32 2, %v1041_v2 }
  0x41   :  { %655 = vmatpush3.msra.mxu0 %v131_v4  ;;  %688 = vmatpush3.msra.mxu1 %v228_v14  ;;  %v125_v22 = vld [vmem:[#allocation5 + $0x40] sm:$0xff]  ;;  %v124_v24 = vld [vmem:[#allocation5 + $0x38] sm:$0xff]  ;;  %v122_v27 = vld [vmem:[#allocation5 + $0x28] sm:$0xff]  ;;  %s565_s3 = sshll.u32 %s957_s22, 4  ;;  %s566_s3 = int_to_ptr.vmem [resolvable:$true] %s565_s3 }
  0x42   :  { %656 = vmatprep.subr.mxu0 %v950_v0  ;;  %v104_v12 = vrot.slane %v1050_v10, %v103_v6  ;;  %v109_v13 = vrot.slane %v1050_v10, %v108_v7  ;;  %689 = vmatprep.subr.mxu1 %v950_v0  ;;  %v121_v28 = vld [vmem:[#allocation5 + $0x20] sm:$0xff]  ;;  %v120_v29 = vld [vmem:[#allocation5 + $0x18] sm:$0xff]  ;;  %v119_v30 = vld [vmem:[#allocation5 + $0x10] sm:$0xff]  ;;  %v136_v53 = vrot.slane %v1050_v10, %v135_v52  ;;  %s915_s27 = scalar_lea.vmem %s566_s3, 128  ;;  %p920_p12 = scmp.lt.s32.totalorder %s566_s3, %s566_s3 }
  0x43   :  { %657 = vmatpush3.msra.mxu0 %v130_v5  ;;  %690 = vmatpush3.msra.mxu1 %v227_v15  ;;  %v118_v31 = vld [vmem:[#allocation5 + $0x8] sm:$0xff]  ;;  %v117_v32 = vld [vmem:[#allocation5] sm:$0xff]  ;;  %v224_v36 = vld [vmem:[#allocation7 + $0x58] sm:$0xff]  ;;  %v952_v15 = vmov 0   ;;  %p916_p11 = scmp.ne.s32.totalorder %s566_s3, %s915_s27  ;;  %p921_p13 = scmp.lt.s32.totalorder %s915_s27, %s915_s27 }
  0x44   :  { %658 = vmatprep.subr.mxu0 %v950_v0  ;;  %v105_v17 = vmul.f32 %v104_v12, %v98_v9  ;;  %691 = vmatprep.subr.mxu1 %v950_v0  ;;  %v223_v37 = vld [vmem:[#allocation7 + $0x50] sm:$0xff]  ;;  %v222_v38 = vld [vmem:[#allocation7 + $0x48] sm:$0xff]  ;;  %v221_v39 = vld [vmem:[#allocation7 + $0x40] sm:$0xff] }
  0x45   :  { %659 = vmatpush3.msra.mxu0 %v129_v8  ;;  %692 = vmatpush3.msra.mxu1 %v226_v18  ;;  %v220_v40 = vld [vmem:[#allocation7 + $0x38] sm:$0xff]  ;;  %v219_v41 = vld [vmem:[#allocation7 + $0x30] sm:$0xff]  ;;  %v218_v42 = vld [vmem:[#allocation7 + $0x28] sm:$0xff]  ;;  %p922_p0 = por %p921_p13, %p920_p12 }
  0x46   :  { %660 = vmatprep.subr.mxu0 %v950_v0  ;;  %v110_v20 = vadd.f32 %v109_v13, %v105_v17  ;;  %693 = vmatprep.subr.mxu1 %v950_v0  ;;  %v217_v43 = vld [vmem:[#allocation7 + $0x20] sm:$0xff]  ;;  %v216_v44 = vld [vmem:[#allocation7 + $0x18] sm:$0xff]  ;;  %v215_v45 = vld [vmem:[#allocation7 + $0x10] sm:$0xff] }
  0x47   :  { %661 = vmatpush3.msra.mxu0 %v128_v11  ;;  %694 = vmatpush3.msra.mxu1 %v225_v21  ;;  %v214_v46 = vld [vmem:[#allocation7 + $0x8] sm:$0xff]  ;;  %v213_v47 = vld [vmem:[#allocation7] sm:$0xff]  ;;  %v324_v48 = vld [vmem:[#allocation8 + $0x78] sm:$0xff]  ;;  %p923_p1 = pnand %p922_p0, %p916_p11 }
  0x48   :  { %662 = vmatprep.subr.mxu0 %v950_v0  ;;  %v112_v23 = vmin.f32 %v110_v20, 0.0  ;;  %695 = vmatprep.subr.mxu1 %v950_v0  ;;  %vm111_vm1 = vcmp.gt.f32.partialorder %v110_v20, 0.0  ;;  %v323_v49 = vld [vmem:[#allocation8 + $0x70] sm:$0xff]  ;;  %v322_v50 = vld [vmem:[#allocation8 + $0x68] sm:$0xff]  ;;  %v321_v51 = vld [vmem:[#allocation8 + $0x60] sm:$0xff] }
  0x49   :  { %663 = vmatpush3.msra.mxu0 %v127_v16  ;;  %696 = vmatpush3.msra.mxu1 %v224_v36  ;;  %v320_v62 = vld [vmem:[#allocation8 + $0x58] sm:$0xff]  ;;  %v319_v63 = vld [vmem:[#allocation8 + $0x50] sm:$0xff]  ;;  %v318_v1 = vld [vmem:[#allocation8 + $0x48] sm:$0xff] }
  0x4a   :  { %664 = vmatprep.subr.mxu0 %v950_v0  ;;  %v113_v25 = vmul.f32 1.442695, %v112_v23  ;;  %697 = vmatprep.subr.mxu1 %v950_v0  ;;  %v317_v3 = vld [vmem:[#allocation8 + $0x40] sm:$0xff]  ;;  %v316_v4 = vld [vmem:[#allocation8 + $0x38] sm:$0xff]  ;;  %v315_v5 = vld [vmem:[#allocation8 + $0x30] sm:$0xff] }
  0x4b   :  { %665 = vmatpush3.msra.mxu0 %v126_v19  ;;  %698 = vmatpush3.msra.mxu1 %v223_v37  ;;  %v314_v6 = vld [vmem:[#allocation8 + $0x28] sm:$0xff]  ;;  %v313_v7 = vld [vmem:[#allocation8 + $0x20] sm:$0xff]  ;;  %v312_v8 = vld [vmem:[#allocation8 + $0x18] sm:$0xff] }
  0x4c   :  { %666 = vmatprep.subr.mxu0 %v950_v0  ;;  %809 = vpow2.f32 %v113_v25  ;;  %699 = vmatprep.subr.mxu1 %v950_v0  ;;  %v311_v9 = vld [vmem:[#allocation8 + $0x10] sm:$0xff]  ;;  %v310_v11 = vld [vmem:[#allocation8 + $0x8] sm:$0xff]  ;;  %v309_v12 = vld [vmem:[#allocation8] sm:$0xff] }
  0x4d   :  { %667 = vmatpush3.msra.mxu0 %v125_v22  ;;  %700 = vmatpush3.msra.mxu1 %v222_v38  ;;  %v427_v13 = vld [vmem:[#allocation10 + $0x78] sm:$0xff]  ;;  %v426_v14 = vld [vmem:[#allocation10 + $0x70] sm:$0xff]  ;;  %v425_v16 = vld [vmem:[#allocation10 + $0x68] sm:$0xff] }
  0x4e   :  { %668 = vmatprep.subr.mxu0 %v950_v0  ;;  %701 = vmatprep.subr.mxu1 %v950_v0  ;;  %v1109_v17 = vld [vmem:[%s1167_s1] sm:$0xff]  ;;  %v424_v18 = vld [vmem:[#allocation10 + $0x60] sm:$0xff]  ;;  %v422_v21 = vld [vmem:[#allocation10 + $0x50] sm:$0xff]  ;;  %s954_s1 = smov 64  }
  0x4f   :  { %669 = vmatpush3.msra.mxu0 %v124_v24  ;;  %702 = vmatpush3.msra.mxu1 %v221_v39  ;;  %v423_v19 = vld [vmem:[#allocation10 + $0x58] sm:$0xff]  ;;  %v421_v22 = vld [vmem:[#allocation10 + $0x48] sm:$0xff]  ;;  %v420_v23 = vld [vmem:[#allocation10 + $0x40] sm:$0xff] }
  0x50   :  { %670 = vmatprep.subr.mxu0 %v950_v0  ;;  %703 = vmatprep.subr.mxu1 %v950_v0  ;;  %v419_v24 = vld [vmem:[#allocation10 + $0x38] sm:$0xff]  ;;  %v418_v25 = vld [vmem:[#allocation10 + $0x30] sm:$0xff] }
  0x51   :  { %671 = vmatpush3.msra.mxu0 %v123_v26  ;;  %704 = vmatpush3.msra.mxu1 %v220_v40  ;;  %v417_v26 = vld [vmem:[#allocation10 + $0x28] sm:$0xff] }
  0x52   :  { %672 = vmatprep.subr.mxu0 %v950_v0  ;;  %705 = vmatprep.subr.mxu1 %v950_v0  ;;  %v413_v40 = vld [vmem:[#allocation10 + $0x8] sm:$0xff] }
  0x53   :  { %673 = vmatpush3.msra.mxu0 %v122_v27  ;;  %706 = vmatpush3.msra.mxu1 %v219_v41  ;;  %v416_v27 = vld [vmem:[#allocation10 + $0x20] sm:$0xff] }
  0x54   :  { %674 = vmatprep.subr.mxu0 %v950_v0  ;;  %707 = vmatprep.subr.mxu1 %v950_v0  ;;  %v412_v41 = vld [vmem:[#allocation10] sm:$0xff] }
  0x55   :  { %675 = vmatpush3.msra.mxu0 %v121_v28  ;;  %708 = vmatpush3.msra.mxu1 %v218_v42  ;;  %v415_v28 = vld [vmem:[#allocation10 + $0x18] sm:$0xff]  ;;  %v327_v42 = vsub.s32 4, %v1041_v2 }
  0x56   :  { %676 = vmatprep.subr.mxu0 %v950_v0  ;;  %709 = vmatprep.subr.mxu1 %v950_v0 }
  0x57   :  { %677 = vmatpush3.msra.mxu0 %v120_v29  ;;  %710 = vmatpush3.msra.mxu1 %v217_v43  ;;  %v414_v29 = vld [vmem:[#allocation10 + $0x10] sm:$0xff]  ;;  %v328_v43 = vrot.slane %v1050_v10, %v327_v42 }
  0x58   :  { %678 = vmatprep.subr.mxu0 %v950_v0  ;;  %711 = vmatprep.subr.mxu1 %v950_v0 }
  0x59   :  { %679 = vmatpush3.msra.mxu0 %v119_v30  ;;  %v810_v33 = vpop.eup %809  ;;  %712 = vmatpush3.msra.mxu1 %v216_v44  ;;  %v231_v30 = vsub.s32 3, %v1041_v2 }
  0x5a   :  { %680 = vmatprep.subr.mxu0 %v950_v0  ;;  %v580_v34 = vadd.f32 -1.0, %v810_v33  ;;  %713 = vmatprep.subr.mxu1 %v950_v0 }
  0x5b   :  { %681 = vmatpush3.msra.mxu0 %v118_v31  ;;  %714 = vmatpush3.msra.mxu1 %v215_v45  ;;  %v232_v31 = vrot.slane %v1050_v10, %v231_v30 }
  0x5c   :  { %682 = vmatprep.subr.mxu0 %v950_v0  ;;  %v116_v35 = vsel %vm111_vm1, %v110_v20, %v580_v34  ;;  %715 = vmatprep.subr.mxu1 %v950_v0  ;;  %v953_v20 = vmov 1  }
  0x5d   :  { %683 = vmatpush3.msra.mxu0 %v117_v32  ;;  %716 = vmatpush3.msra.mxu1 %v214_v46 }
  0x5e   :  { %722 = vmatprep.subr.mxu0 %v950_v0  ;;  %685 = vmatmul.mubr.f32.vlgmr.msra.gmra.mxu0 %v116_v35 }
  0x5f   :  { %754 = vmatprep.mubr.msk.f32.mxu0 %vm951_vm0, %v950_v0  ;;  %717 = vmatprep.subr.mxu1 %v950_v0 }
  0x60   :  { %718 = vmatpush3.msra.mxu1 %v213_v47  ;;  %723 = vmatpush3.msra.mxu0 %v324_v48  ;;  %v583_v47 = vld [vmem:[%s1173_s7] ss:$0 sm:$0xff]  ;;  %s956_s7 = smov 96  }
  0x61   :  { %757 = vmatprep.subr.mxu1 %v950_v0  ;;  %724 = vmatprep.subr.mxu0 %v950_v0  ;;  %v552_v48 = vmul.f32 %v583_v47, %v1109_v17 }
  0x62   :  { %725 = vmatpush3.msra.mxu0 %v323_v49  ;;  %807 = vset.pattern.permute.xlu0 %v952_v15 }
  0x63   :  { %726 = vmatprep.subr.mxu0 %v950_v0  ;;  %504 = vperm.xlu0 %807, %v1109_v17   ;;  %v554_v49 = vsel %vm553_vm4, %v552_v48, 0.0 }
  0x64   :  { %727 = vmatpush3.msra.mxu0 %v322_v50  ;;  %555 = vadd.xlane.f32.xlu1 %v554_v49  ;;  %v509_v50 = vsub.s32 6, %v1041_v2 }
  0x65   :  { %728 = vmatprep.subr.mxu0 %v950_v0 }
  0x66   :  { %729 = vmatpush3.msra.mxu0 %v321_v51  ;;  %v518_v51 = vsub.s32 7, %v1041_v2 }
  0x67   :  { %730 = vmatprep.subr.mxu0 %v950_v0  ;;  %808 = vset.pattern.permute.xlu0 %v953_v20 }
  0x68   :  { %731 = vmatpush3.msra.mxu0 %v320_v62  ;;  %513 = vperm.xlu0 %808, %v1109_v17  }
  0x69   :  { %732 = vmatprep.subr.mxu0 %v950_v0 }
  0x6a   :  { %733 = vmatpush3.msra.mxu0 %v319_v63 }
  0x6b   :  { %734 = vmatprep.subr.mxu0 %v950_v0 }
  0x6c   :  { %735 = vmatpush3.msra.mxu0 %v318_v1 }
  0x6d   :  { %736 = vmatprep.subr.mxu0 %v950_v0 }
  0x6e   :  { %737 = vmatpush3.msra.mxu0 %v317_v3 }
  0x6f   :  { %738 = vmatprep.subr.mxu0 %v950_v0 }
  0x70   :  { %739 = vmatpush3.msra.mxu0 %v316_v4 }
  0x71   :  { %740 = vmatprep.subr.mxu0 %v950_v0 }
  0x72   :  { %741 = vmatpush3.msra.mxu0 %v315_v5 }
  0x73   :  { %742 = vmatprep.subr.mxu0 %v950_v0 }
  0x74   :  { %743 = vmatpush3.msra.mxu0 %v314_v6 }
  0x75   :  { %744 = vmatprep.subr.mxu0 %v950_v0 }
  0x76   :  { %745 = vmatpush3.msra.mxu0 %v313_v7 }
  0x77   :  { %746 = vmatprep.subr.mxu0 %v950_v0 }
  0x78   :  { %747 = vmatpush3.msra.mxu0 %v312_v8 }
  0x79   :  { %748 = vmatprep.subr.mxu0 %v950_v0 }
  0x7a   :  { %749 = vmatpush3.msra.mxu0 %v311_v9 }
  0x7b   :  { %750 = vmatprep.subr.mxu0 %v950_v0 }
  0x7c   :  { %751 = vmatpush3.msra.mxu0 %v310_v11 }
  0x7d   :  { %752 = vmatprep.subr.mxu0 %v950_v0 }
  0x7e   :  { %753 = vmatpush3.msra.mxu0 %v309_v12 }
  0xde   :  { %v505_v52 = vpop.permute.xlu0 %504 }
  0xed   :  { %v556_v3 = vpop.xlane.xlu1 %555 }
 0x11e   :  { %v203_v54 = vpop.f32.mrf.mxu0 }
 0x11f   :  { %v204_v55 = vadd.f32 %v203_v54, %v136_v53  ;;  %v510_v53 = vrot.slane %v1050_v10, %v509_v50  ;;  %v519_v54 = vrot.slane %v1050_v10, %v518_v51 }
 0x120   :  { %v686_v56 = vpop.f32.mrf.mxu0 }
 0x121   :  { %v208_v57 = vmin.f32 %v204_v55, 0.0  ;;  %vm207_vm2 = vcmp.gt.f32.partialorder %v204_v55, 0.0  ;;  %v514_v56 = vpop.permute.xlu0 %513 }
 0x123   :  { %v209_v58 = vmul.f32 1.442695, %v208_v57  ;;  %v511_v57 = vmul.f32 %v510_v53, %v505_v52 }
 0x125   :  { %811 = vpow2.f32 %v209_v58  ;;  %v520_v58 = vmul.f32 %v519_v54, %v514_v56 }
 0x132   :  { %v812_v59 = vpop.eup %811 }
 0x133   :  { %v581_v60 = vadd.f32 -1.0, %v812_v59 }
 0x135   :  { %v212_v61 = vsel %vm207_vm2, %v204_v55, %v581_v60  ;;  %v430_v55 = vsub.s32 5, %v1041_v2  ;;  %v537_v2 = vld [vmem:[%s1175_s9] sm:$0xff] }
 0x136   :  { %720 = vmatmul.mubr.f32.vlgmr.msra.gmra.mxu1 %v212_v61  ;;  %v521_v61 = vadd.f32 %v520_v58, %v511_v57 }
 0x137   :  { %789 = vmatprep.mubr.msk.f32.mxu1 %vm951_vm0, %v950_v0  ;;  %758 = vmatpush3.msra.mxu1 %v427_v13  ;;  %v431_v59 = vrot.slane %v1050_v10, %v430_v55 }
 0x138   :  { %759 = vmatprep.subr.mxu1 %v950_v0 }
 0x139   :  { %760 = vmatpush3.msra.mxu1 %v426_v14 }
 0x13a   :  { %761 = vmatprep.subr.mxu1 %v950_v0 }
 0x13b   :  { %762 = vmatpush3.msra.mxu1 %v425_v16 }
 0x13c   :  { %763 = vmatprep.subr.mxu1 %v950_v0 }
 0x13d   :  { %764 = vmatpush3.msra.mxu1 %v424_v18 }
 0x13e   :  { %765 = vmatprep.subr.mxu1 %v950_v0 }
 0x13f   :  { %766 = vmatpush3.msra.mxu1 %v423_v19 }
 0x140   :  { %767 = vmatprep.subr.mxu1 %v950_v0 }
 0x141   :  { %768 = vmatpush3.msra.mxu1 %v422_v21 }
 0x142   :  { %769 = vmatprep.subr.mxu1 %v950_v0 }
 0x143   :  { %770 = vmatpush3.msra.mxu1 %v421_v22 }
 0x144   :  { %771 = vmatprep.subr.mxu1 %v950_v0 }
 0x145   :  { %772 = vmatpush3.msra.mxu1 %v420_v23 }
 0x146   :  { %773 = vmatprep.subr.mxu1 %v950_v0 }
 0x147   :  { %774 = vmatpush3.msra.mxu1 %v419_v24 }
 0x148   :  { %775 = vmatprep.subr.mxu1 %v950_v0 }
 0x149   :  { %776 = vmatpush3.msra.mxu1 %v418_v25 }
 0x14a   :  { %777 = vmatprep.subr.mxu1 %v950_v0 }
 0x14b   :  { %778 = vmatpush3.msra.mxu1 %v417_v26 }
 0x14c   :  { %779 = vmatprep.subr.mxu1 %v950_v0 }
 0x14d   :  { %780 = vmatpush3.msra.mxu1 %v416_v27 }
 0x14e   :  { %781 = vmatprep.subr.mxu1 %v950_v0 }
 0x14f   :  { %782 = vmatpush3.msra.mxu1 %v415_v28 }
 0x150   :  { %783 = vmatprep.subr.mxu1 %v950_v0 }
 0x151   :  { %784 = vmatpush3.msra.mxu1 %v414_v29 }
 0x152   :  { %785 = vmatprep.subr.mxu1 %v950_v0 }
 0x153   :  { %786 = vmatpush3.msra.mxu1 %v413_v40 }
 0x154   :  { %787 = vmatprep.subr.mxu1 %v950_v0  ;;  %v533_v0 = vld [vmem:[#allocation11] sm:$0xff] }
 0x155   :  { %788 = vmatpush3.msra.mxu1 %v412_v41 }
 0x1f6   :  { %v299_v32 = vpop.f32.mrf.mxu1 }
 0x1f7   :  { %v300_v33 = vadd.f32 %v299_v32, %v232_v31 }
 0x1f8   :  { %v721_v34 = vpop.f32.mrf.mxu1 }
 0x1f9   :  { %v304_v35 = vmin.f32 %v300_v33, 0.0  ;;  %vm303_vm3 = vcmp.gt.f32.partialorder %v300_v33, 0.0 }
 0x1fb   :  { %v305_v36 = vmul.f32 1.442695, %v304_v35 }
 0x1fd   :  { %813 = vpow2.f32 %v305_v36 }
 0x20a   :  { %v814_v37 = vpop.eup %813 }
 0x20b   :  { %v582_v38 = vadd.f32 -1.0, %v814_v37 }
 0x20d   :  { %v308_v39 = vsel %vm303_vm3, %v300_v33, %v582_v38 }
 0x20e   :  { %755 = vmatmul.mubr.f32.vlgmr.msra.gmra.mxu0 %v308_v39 }
 0x2ce   :  { %v395_v44 = vpop.f32.mrf.mxu0 }
 0x2cf   :  { %v396_v45 = vadd.f32 %v395_v44, %v328_v43 }
 0x2d0   :  { %v756_v46 = vpop.f32.mrf.mxu0 }
 0x2d1   :  { %404 = vrot.lane.b32.xlu0 %v396_v45, %s954_s1  ;;  %790 = vmatmul.mubr.f32.vlgmr.msra.gmra.mxu1 %v396_v45 }
 0x2d5   :  { %408 = vrot.lane.b32.xlu0 %v396_v45, %s955_s13 }
 0x343   :  { %v405_v10 = vpop.permute.xlu0 %404 }
 0x347   :  { %v409_v9 = vpop.permute.xlu0 %408 }
 0x391   :  { %v498_v60 = vpop.f32.mrf.mxu1 }
 0x392   :  { %v499_v62 = vadd.f32 %v498_v60, %v431_v59 }
 0x393   :  { %v791_v63 = vpop.f32.mrf.mxu1 }
 0x394   :  { %v522_v1 = vmul.f32 %v521_v61, %v499_v62 }
 0x396   :  { %523 = vadd.xlane.f32.xlu1 %v522_v1 }
 0x3a7   :  { %400 = vrot.lane.b32.xlu1 %v396_v45, %s956_s7 }
 0x41f   :  { %v524_v4 = vpop.xlane.xlu1 %523 }
 0x420   :  { %v538_v5 = vadd.f32 %v537_v2, %v524_v4 }
 0x422   :  { %540 = vst.msk [vmem:[%s1175_s9] sm:$0xff] %vm531_vm5, %v538_v5 }
 0x423   :  { %v401_v6 = vpop.permute.xlu1 %400 }
 0x424   :  { %v403_v7 = vadd.f32 %v401_v6, %v396_v45 }
 0x426   :  { %v407_v8 = vadd.f32 %v405_v10, %v403_v7 }
 0x428   :  { %v411_v11 = vadd.f32 %v409_v9, %v407_v8 }
 0x429   :  { %v544_v12 = vld [vmem:[%s1175_s9] sm:$0xff] }
 0x42a   :  { %v557_v13 = vadd.f32 %v556_v3, %v544_v12  ;;  %v534_v14 = vadd.f32 %v533_v0, %v411_v11 }
 0x42c   :  { %558 = vst.msk [vmem:[%s1175_s9] sm:$0xff] %vm531_vm5, %v557_v13 }
 0x42d   :  { %536 = vst.msk [vmem:[#allocation11] sm:$0xff] %vm529_vm6, %v534_v14 }
 0x42e   :  { %926 = shalt.err (!%p923_p1)
}
 0x42f   :  { %568 = dma.vmem_to_hbm [thread:$0]  %s566_s3, 128, %s1174_s8, [#allocation4]  }
 0x430   :  { %941 = dma.done.wait [#allocation4], 128  }
 0x431   :  { %942 = vsyncadd [#allocation4], 4294967168 }
 0x432   :  { %576 = vsyncpa [#allocation3], 1 }
 0x433   :  { %577 = vsyncpa [#allocation6], 1 }
 0x434   :  { %578 = vsyncpa [#allocation9], 1 }
 0x435   :  { %579 = vsyncpa [#allocation4], 1 }

</bundles_post_ra>
